<compile_context>
chip_gen: v6e
topology: v6e:2x2x1
jax: 0.10.0
libtpu: 0.0.40
codegen_flags: <defaults>
</compile_context>

<pallas_src>
import jax
import jax.numpy as jnp
from jax.experimental import pallas as pl
from jax.experimental.pallas import tpu as pltpu


def _vmem_capacity_bytes():
    try:
        return int(pltpu.get_tpu_info().vmem_capacity_bytes)
    except Exception:
        return 64 << 20                      # conservative fallback (v7x-sized)


def _pick_tile(n, max_tile, multiple):
    """Largest divisor of n that is a multiple of `multiple` and <= max_tile.
    Falls back to the smallest such divisor, then to n (full extent, always
    layout-legal under the (8,128) BlockSpec rule)."""
    divs = [d for d in range(1, n + 1) if n % d == 0 and d % multiple == 0]
    if not divs:
        return n
    fitting = [d for d in divs if d <= max_tile]
    return max(fitting) if fitting else min(divs)


def _wgap_kernel(x_ref, wt_ref, b_ref, o_ref, acc_ref):
    # x_ref:   (b_tile, C, hw_tile)  -- HW chunk on lanes, C on sublanes
    # wt_ref:  (C, classes)          -- fc weight^T, pre-scaled by 1/(H*W)
    # b_ref:   (1, classes)          -- fc bias, f32
    # o_ref:   (b_tile, classes)
    # acc_ref: (b_tile, C) f32 scratch -- running pooled sums (C on lanes)
    hw_step = pl.program_id(1)

    @pl.when(hw_step == 0)
    def _init():
        acc_ref[...] = jnp.zeros_like(acc_ref)

    # Partial global-average-pool: lane-reduce this HW chunk straight into the
    # f32 accumulator (no full-block f32 copy of x is materialized).
    acc_ref[...] += jnp.sum(x_ref[...], axis=-1, dtype=jnp.float32)

    @pl.when(hw_step == pl.num_programs(1) - 1)
    def _finalize():
        # FC on the MXU, once per batch tile: pooled_sum @ (W^T / HW) + b.
        pooled = acc_ref[...].astype(wt_ref.dtype)
        logits = jnp.dot(pooled, wt_ref[...],
                         preferred_element_type=jnp.float32) + b_ref[...]
        o_ref[...] = logits.astype(o_ref.dtype)


def wgap_forward(x_nchw, fc_weight, fc_bias):
    """x_nchw: (B, C, H, W); fc_weight: (classes, C); fc_bias: (classes,)."""
    B, C, H, W = x_nchw.shape
    classes = fc_weight.shape[0]
    HW = H * W
    itemsize = x_nchw.dtype.itemsize
    sub = 32 // itemsize                      # native sublane packing: 8/16/32

    vmem_cap = _vmem_capacity_bytes()
    x_budget = max(4 << 20, vmem_cap // 8)    # per input buffer (double-buffered)

    # Contiguous (free) reshape -- no transpose, no extra HBM pass over x.
    x_flat = x_nchw.reshape(B, C, HW)

    # Fold the 1/(H*W) pooling scale into the transposed classifier weight.
    # Large heads go to bf16 (MXU-native everywhere) so the resident weight
    # does not compete with the x stream for VMEM; small heads stay f32.
    wt_dtype = jnp.bfloat16 if C * classes * 4 > (2 << 20) else jnp.float32
    wt_itemsize = jnp.dtype(wt_dtype).itemsize
    wt = (fc_weight.T.astype(jnp.float32) * (1.0 / float(HW))).astype(wt_dtype)
    b = fc_bias.reshape(1, classes).astype(jnp.float32)

    # ---- tile selection (layout-legal + VMEM-bounded) -----------------------
    c_pad = -(-C // sub) * sub                # sublane padding of the x block

    b_cap = 32
    if B >= 16:
        b_cap = min(b_cap, B // 2)            # keep >=2 "parallel" steps (v7x 2-TC)
    b_tile = _pick_tile(B, b_cap, sub)

    def x_block_bytes(bt, hwt):
        return bt * c_pad * (-(-hwt // 128) * 128) * itemsize

    max_hw = max(128, (x_budget // (b_tile * c_pad * itemsize)) // 128 * 128)
    hw_tile = _pick_tile(HW, max_hw, 128)     # 128-multiple divisor of HW, else full

    if x_block_bytes(b_tile, hw_tile) > x_budget:
        # Fallback HW chunk (no 128-multiple divisor) came out big: shrink batch.
        hw_pad = -(-hw_tile // 128) * 128
        max_b = max(sub, (x_budget // (c_pad * hw_pad * itemsize)) // sub * sub)
        b_tile = _pick_tile(B, max_b, sub)
    # TODO(synk): for extreme C*HW per single example, add a channel grid axis.

    grid = (B // b_tile, HW // hw_tile)

    # ---- VMEM footprint -> vmem_limit + cost hint ---------------------------
    classes_pad = -(-classes // 128) * 128
    wt_sub = 32 // wt_itemsize
    wt_bytes = (-(-C // wt_sub) * wt_sub) * classes_pad * wt_itemsize
    bias_bytes = 8 * classes_pad * 4
    out_bytes = max(b_tile, sub) * classes_pad * itemsize
    acc_bytes = max(b_tile, 8) * (-(-C // 128) * 128) * 4
    vmem_need = (2 * x_block_bytes(b_tile, hw_tile)   # double-buffered x stream
                 + 2 * wt_bytes + 2 * bias_bytes      # weight/bias (fetched once)
                 + 2 * out_bytes + acc_bytes)
    vmem_limit = int(min(max(vmem_need + (8 << 20), 32 << 20),
                         vmem_cap - (4 << 20)))

    cost = pl.CostEstimate(
        flops=B * HW * C + 2 * B * C * classes,
        transcendentals=0,
        bytes_accessed=(x_flat.size * itemsize + wt.size * wt_itemsize
                        + b.size * 4 + B * classes * itemsize),
    )

    return pl.pallas_call(
        _wgap_kernel,
        out_shape=jax.ShapeDtypeStruct((B, classes), x_nchw.dtype),
        grid_spec=pltpu.PrefetchScalarGridSpec(
            num_scalar_prefetch=0,
            grid=grid,
            in_specs=[
                pl.BlockSpec((b_tile, C, hw_tile), lambda i, j: (i, 0, j)),
                pl.BlockSpec((C, classes), lambda i, j: (0, 0)),
                pl.BlockSpec((1, classes), lambda i, j: (0, 0)),
            ],
            out_specs=pl.BlockSpec((b_tile, classes), lambda i, j: (i, 0)),
            scratch_shapes=[pltpu.VMEM((b_tile, C), jnp.float32)],
        ),
        compiler_params=pltpu.CompilerParams(
            dimension_semantics=("parallel", "arbitrary"),
            vmem_limit_bytes=vmem_limit,
        ),
        cost_estimate=cost,
    )(x_flat, wt, b)


def _reference(x_nchw, fc_weight, fc_bias):
    pooled = jnp.mean(x_nchw, axis=(2, 3))        # AdaptiveAvgPool2d(1) + flatten
    return pooled @ fc_weight.T + fc_bias


if __name__ == "__main__":
    key = jax.random.PRNGKey(0)
    k_x, k_w, k_b = jax.random.split(key, 3)

    B, C, H, W = 2, 4, 16, 16
    classes = 8

    x = jax.random.normal(k_x, (B, C, H, W), dtype=jnp.float32)
    # Deterministic parameter init (PyTorch-Linear-like uniform scale).
    bound = 1.0 / jnp.sqrt(jnp.float32(C))
    fc_weight = jax.random.uniform(k_w, (classes, C), jnp.float32, -bound, bound)
    fc_bias = jax.random.uniform(k_b, (classes,), jnp.float32, -bound, bound)

    out = jax.block_until_ready(wgap_forward(x, fc_weight, fc_bias))
    ref = _reference(x, fc_weight, fc_bias)

    assert out.shape == (B, classes)
    assert jnp.allclose(out, ref, atol=2e-5, rtol=1e-5)

    print("KERNEL_OK")
</pallas_src>

<mosaic_0001>
module attributes {stable_mosaic.version = 11 : i64} {
  func.func @_wgap_kernel(%arg0: i32, %arg1: i32, %arg2: memref<2x4x256xf32, #tpu.memory_space<vmem>>, %arg3: memref<4x8xf32, #tpu.memory_space<vmem>>, %arg4: memref<1x8xf32, #tpu.memory_space<vmem>>, %arg5: memref<2x8xf32, #tpu.memory_space<vmem>>, %arg6: memref<2x4xf32, #tpu.memory_space<vmem>>) attributes {dimension_semantics = [#tpu.dimension_semantics<parallel>, #tpu.dimension_semantics<arbitrary>], iteration_bounds = array<i64: 1, 1>, scalar_prefetch = 0 : i64, scratch_operands = 1 : i64, tpu.core_type = #tpu.core_type<tc>, window_params = [{transform_indices = @transform_0, window_bounds = array<i64: 2, 4, 256>}, {pipeline_mode = #tpu.pipeline_mode<synchronous>, transform_indices = @transform_1, window_bounds = array<i64: 4, 8>}, {pipeline_mode = #tpu.pipeline_mode<synchronous>, transform_indices = @transform_2, window_bounds = array<i64: 1, 8>}, {transform_indices = @transform_3, window_bounds = array<i64: 2, 8>}]} {
    %c0_i32 = arith.constant 0 : i32
    %0 = arith.cmpi eq, %arg1, %c0_i32 : i32
    %1 = arith.extui %0 : i1 to i32
    %c0_i32_0 = arith.constant 0 : i32
    %2 = arith.cmpi ne, %1, %c0_i32_0 : i32
    scf.if %2 {
      %cst_9 = arith.constant 0.000000e+00 : f32
      %11 = vector.broadcast %cst_9 : f32 to vector<2x4xf32>
      %c0_10 = arith.constant 0 : index
      %c0_11 = arith.constant 0 : index
      %12 = vector.load %arg6[%c0_10, %c0_11] : memref<2x4xf32, #tpu.memory_space<vmem>>, vector<2x4xf32>
      tpu.vector_store %arg6[%c0_10, %c0_11], %11 {strides = array<i32>} : memref<2x4xf32, #tpu.memory_space<vmem>>, vector<2x4xf32>,
    } else {
    }
    %c0 = arith.constant 0 : index
    %c0_1 = arith.constant 0 : index
    %3 = vector.load %arg6[%c0, %c0_1] : memref<2x4xf32, #tpu.memory_space<vmem>>, vector<2x4xf32>
    %c0_2 = arith.constant 0 : index
    %c0_3 = arith.constant 0 : index
    %c0_4 = arith.constant 0 : index
    %4 = vector.load %arg2[%c0_2, %c0_3, %c0_4] : memref<2x4x256xf32, #tpu.memory_space<vmem>>, vector<2x4x256xf32>
    %cst = arith.constant dense<0.000000e+00> : vector<2x4xf32>
    %5 = vector.multi_reduction <add>, %4, %cst [2] : vector<2x4x256xf32> to vector<2x4xf32>
    %6 = arith.addf %3, %5 : vector<2x4xf32>
    %c0_5 = arith.constant 0 : index
    %c0_6 = arith.constant 0 : index
    %7 = vector.load %arg6[%c0_5, %c0_6] : memref<2x4xf32, #tpu.memory_space<vmem>>, vector<2x4xf32>
    tpu.vector_store %arg6[%c0_5, %c0_6], %6 {strides = array<i32>} : memref<2x4xf32, #tpu.memory_space<vmem>>, vector<2x4xf32>,
    %c0_i32_7 = arith.constant 0 : i32
    %8 = arith.cmpi eq, %arg1, %c0_i32_7 : i32
    %9 = arith.extui %8 : i1 to i32
    %c0_i32_8 = arith.constant 0 : i32
    %10 = arith.cmpi ne, %9, %c0_i32_8 : i32
    scf.if %10 {
      %c0_9 = arith.constant 0 : index
      %c0_10 = arith.constant 0 : index
      %11 = vector.load %arg6[%c0_9, %c0_10] : memref<2x4xf32, #tpu.memory_space<vmem>>, vector<2x4xf32>
      %c0_11 = arith.constant 0 : index
      %c0_12 = arith.constant 0 : index
      %12 = vector.load %arg3[%c0_11, %c0_12] : memref<4x8xf32, #tpu.memory_space<vmem>>, vector<4x8xf32>
      %cst_13 = arith.constant dense<0.000000e+00> : vector<2x8xf32>
      %13 = tpu.matmul %11, %12, %cst_13 {dimension_numbers = #tpu.dot_dimension_numbers<[1], [0], [0], [1], [0, 0, 1, 1], [], []>} : vector<2x4xf32>, vector<4x8xf32>, vector<2x8xf32> -> vector<2x8xf32>
      %c0_14 = arith.constant 0 : index
      %c0_15 = arith.constant 0 : index
      %14 = vector.load %arg4[%c0_14, %c0_15] : memref<1x8xf32, #tpu.memory_space<vmem>>, vector<1x8xf32>
      %15 = vector.broadcast %14 : vector<1x8xf32> to vector<2x8xf32>
      %16 = arith.addf %13, %15 : vector<2x8xf32>
      %c0_16 = arith.constant 0 : index
      %c0_17 = arith.constant 0 : index
      %17 = vector.load %arg5[%c0_16, %c0_17] : memref<2x8xf32, #tpu.memory_space<vmem>>, vector<2x8xf32>
      tpu.vector_store %arg5[%c0_16, %c0_17], %16 {strides = array<i32>} : memref<2x8xf32, #tpu.memory_space<vmem>>, vector<2x8xf32>,
    } else {
    }
    return
  }
  func.func @transform_0(%arg0: i32, %arg1: i32) -> (i32, i32, i32) {
    %c0_i32 = arith.constant 0 : i32
    %c0_i32_0 = arith.constant 0 : i32
    return %arg0, %c0_i32, %arg1 : i32, i32, i32
  }
  func.func @transform_1(%arg0: i32, %arg1: i32) -> (i32, i32) {
    %c0_i32 = arith.constant 0 : i32
    %c0_i32_0 = arith.constant 0 : i32
    %c0_i32_1 = arith.constant 0 : i32
    return %c0_i32, %c0_i32_0 : i32, i32
  }
  func.func @transform_2(%arg0: i32, %arg1: i32) -> (i32, i32) {
    %c0_i32 = arith.constant 0 : i32
    %c0_i32_0 = arith.constant 0 : i32
    %c0_i32_1 = arith.constant 0 : i32
    return %c0_i32, %c0_i32_0 : i32, i32
  }
  func.func @transform_3(%arg0: i32, %arg1: i32) -> (i32, i32) {
    %c0_i32 = arith.constant 0 : i32
    %c0_i32_0 = arith.constant 0 : i32
    return %arg0, %c0_i32 : i32, i32
  }
}

</mosaic_0001>

<bundles_post_ra>
// kernel: tpu_custom_call.1
= control target key start
LH: loop header
LB: loop body
LE: loop exit
PB: predicated region body
PF: predicated region fallthrough
CT: control target
= control target key end

     0   :  { %8 = vsyncpa [#allocation4], 0  ;;  %s323_s0 = inlined_call_operand.hbm [shape: f32[2,4,256], index: 0, kind: input, shape index: {}]   ;;  %s324_s1 = inlined_call_operand.hbm [shape: f32[4,8], index: 1, kind: input, shape index: {}]   ;;  %s325_s2 = inlined_call_operand.vmem [shape: f32[1,8], index: 2, kind: input, shape index: {}]   ;;  %s326_s3 = inlined_call_operand.hbm [shape: f32[2,8], index: 3, kind: output, shape index: {}]  }
   0x1   :  { %9 = vsyncpa [#allocation7], 0 }
   0x2   :  { %10 = vsyncpa [#allocation5], 0  ;;  %s277_s12 = smov [#allocation3]  }
   0x3   :  { %s16_s13 = sshll.u32 %s277_s12, 4  ;;  %s17_s13 = int_to_ptr.vmem [resolvable:$true] %s16_s13 }
   0x4   :  { %s219_s14 = scalar_lea.vmem %s17_s13, 256  ;;  %p224_p1 = scmp.lt.s32.totalorder %s17_s13, %s17_s13 }
   0x5   :  { %p220_p0 = scmp.ne.s32.totalorder %s17_s13, %s219_s14  ;;  %p225_p2 = scmp.lt.s32.totalorder %s219_s14, %s219_s14 }
   0x7   :  { %p226_p3 = por %p225_p2, %p224_p1 }
   0x9   :  { %p227_p4 = pnand %p226_p3, %p220_p0 }
   0xb   :  { %230 = shalt.err (!%p227_p4)
}
   0xc   :  { %s278_s15 = smov 128   ;;  %s279_s16 = smov 8  }
   0xd   :  { %22 = dma.hbm_to_vmem [thread:$0]  %s323_s0, 256, %s17_s13, [#allocation4], %s278_s15, %s278_s15, %s279_s16  }
   0xe   :  { %s280_s19 = smov [#allocation6]  }
   0xf   :  { %s29_s20 = sshll.u32 %s280_s19, 4  ;;  %s30_s20 = int_to_ptr.vmem [resolvable:$true] %s29_s20 }
  0x10   :  { %s239_s21 = scalar_lea.vmem %s30_s20, 64  ;;  %p244_p6 = scmp.lt.s32.totalorder %s30_s20, %s30_s20 }
  0x11   :  { %p240_p5 = scmp.ne.s32.totalorder %s30_s20, %s239_s21  ;;  %p245_p7 = scmp.lt.s32.totalorder %s239_s21, %s239_s21 }
  0x13   :  { %p246_p8 = por %p245_p7, %p244_p6 }
  0x15   :  { %p247_p9 = pnand %p246_p8, %p240_p5 }
  0x17   :  { %250 = shalt.err (!%p247_p9)
}
  0x18   :  { %32 = dma.hbm_to_vmem [thread:$0]  %s324_s1, 64, %s30_s20, [#allocation7]  }
  0x19   :  { %271 = dma.done.wait [#allocation4], 256  }
  0x1a   :  { %272 = vsyncadd [#allocation4], 4294967040 }
  0x1b   :  { %273 = dma.done.wait [#allocation7], 64  }
  0x1c   :  { %274 = vsyncadd [#allocation7], 4294967232  ;;  %vm56_vm0 = vcmask 1043456   ;;  %v48_v0 = vld [vmem:[#allocation3] sm:$0xff]  ;;  %v49_v1 = vld [vmem:[#allocation3 + $0x8] sm:$0xff]  ;;  %vm45_vm1 = vcmask 25600   ;;  %v69_v12 = vlaneseq }
  0x1d   :  { %v52_v2 = vcombine.high %v48_v0, %v48_v0  ;;  %v57_v3 = vsel %vm56_vm0, %v48_v0, 0.0  ;;  %v53_v4 = vcombine.high %v49_v1, %v49_v1  ;;  %v62_v6 = vsel %vm56_vm0, %v49_v1, 0.0  ;;  %v89_v11 = vld [vmem:[#allocation6] sm:$0xf]  ;;  %v192_v24 = vld [vmem:[%s325_s2] ss:$0 sm:$0xff] }
  0x1e   :  { %v281_v10 = vmov 0.0   ;;  %vm282_vm2 = vmmov 0   ;;  %v70_v13 = vand.u32 127, %v69_v12  ;;  %v72_v14 = vshrl.u32 %v69_v12, 7  ;;  %s283_s24 = smov [#allocation8]  }
  0x1f   :  { %v58_v5 = vsel %vm56_vm0, %v52_v2, 0.0  ;;  %v63_v7 = vsel %vm56_vm0, %v53_v4, 0.0  ;;  %46 = vst.msk [vmem:[#allocation2] sm:$0x3] %vm45_vm1, %v281_v10  ;;  %197 = vmatprep.subr.mxu0 %v281_v10  ;;  %199 = vmatprep.mubr.msk.f32.mxu0 %vm282_vm2, %v281_v10  ;;  %vm79_vm3 = vcmask 1041409   ;;  %vm97_vm4 = vcmask 31744  }
  0x20   :  { %v59_v8 = vadd.f32 %v58_v5, %v57_v3  ;;  %v64_v9 = vadd.f32 %v63_v7, %v62_v6  ;;  %198 = vmatpush3.msk.msra.mxu0 %vm56_vm0, %v89_v11  ;;  %v73_v16 = vsub.s32 %v70_v13, %v72_v14  ;;  %s182_s25 = sshll.u32 %s283_s24, 4  ;;  %vm174_vm5 = vcmask 58368   ;;  %s183_s25 = int_to_ptr.vmem [resolvable:$true] %s182_s25 }
  0x21   :  { %s251_s26 = scalar_lea.vmem %s183_s25, 32  ;;  %p256_p11 = scmp.lt.s32.totalorder %s183_s25, %s183_s25 }
  0x22   :  { %60 = vadd.xlane.f32.xlu0 %v59_v8  ;;  %p252_p10 = scmp.ne.s32.totalorder %s183_s25, %s251_s26  ;;  %p257_p12 = scmp.lt.s32.totalorder %s251_s26, %s251_s26 }
  0x24   :  { %p258_p13 = por %p257_p12, %p256_p11 }
  0x26   :  { %65 = vadd.xlane.f32.xlu0 %v64_v9  ;;  %v47_v20 = vld [vmem:[#allocation2] sm:$0x3]  ;;  %p259_p0 = pnand %p258_p13, %p252_p10 }
  0xab   :  { %v61_v15 = vpop.xlane.xlu0 %60 }
  0xac   :  { %v74_v18 = vrot.slane %v61_v15, %v73_v16 }
  0xaf   :  { %v66_v17 = vpop.xlane.xlu0 %65 }
  0xb0   :  { %v78_v19 = vrot.slane %v66_v17, %v73_v16 }
  0xb2   :  { %v80_v21 = vsel %vm79_vm3, %v78_v19, %v74_v18 }
  0xb3   :  { %v82_v22 = vadd.f32 %v80_v21, %v47_v20 }
  0xb5   :  { %84 = vst.msk [vmem:[#allocation2] sm:$0x3] %vm45_vm1, %v82_v22 }
  0xbc   :  { %v88_v23 = vld [vmem:[#allocation2] sm:$0x3] }
  0xbd   :  { %200 = vmatmul.mubr.msk.f32.vlgmr.msra.gmra.mxu0 %vm97_vm4, %v88_v23 }
 0x17d   :  { %v170_v25 = vpop.f32.mrf.mxu0 }
 0x17e   :  { %v171_v26 = vadd.f32 %v192_v24, %v170_v25 }
 0x17f   :  { %v201_v27 = vpop.f32.mrf.mxu0 }
 0x180   :  { %175 = vst.msk [vmem:[#allocation8] sm:$0x3] %vm174_vm5, %v171_v26 }
 0x181   :  { %262 = shalt.err (!%p259_p0)
}
 0x182   :  { %185 = dma.vmem_to_hbm [thread:$0]  %s183_s25, 32, %s326_s3, [#allocation5]  }
 0x183   :  { %275 = dma.done.wait [#allocation5], 32  }
 0x184   :  { %276 = vsyncadd [#allocation5], 4294967264 }
 0x185   :  { %189 = vsyncpa [#allocation4], 1 }
 0x186   :  { %190 = vsyncpa [#allocation7], 1 }
 0x187   :  { %191 = vsyncpa [#allocation5], 1 }

</bundles_post_ra>
